<compile_context>
chip_gen: v7x
topology: tpu7x:2x2x1
jax: 0.10.0
libtpu: 0.0.40
codegen_flags: <defaults>
</compile_context>

<pallas_src>
import jax
import jax.numpy as jnp
from jax.experimental import pallas as pl
from jax.experimental.pallas import tpu as pltpu

EPS = 1e-5  # PyTorch BatchNorm1d default


def _cdiv(a, b):
    return -(-a // b)


def _round_up(n, m):
    return _cdiv(n, m) * m


def _mlp_kernel(x_ref, w1_ref, b1_ref, w2_ref, b2_ref, w3_ref, b3_ref, o_ref):
    # x tile arrives as f32; cast to bf16 in-kernel (VPU slot, hidden under the MXU work).
    x = x_ref[...].astype(jnp.bfloat16)
    # Block 1: folded (Linear+BN), block-diagonal over the packed batch rows -> ReLU.
    h = jnp.dot(x, w1_ref[...], preferred_element_type=jnp.float32)
    h = jnp.maximum(h + b1_ref[...], 0.0)
    # Block 2: folded (Linear+BN), block-diagonal -> ReLU.  Dropout (inference) == identity.
    h = jnp.dot(h.astype(jnp.bfloat16), w2_ref[...], preferred_element_type=jnp.float32)
    h = jnp.maximum(h + b2_ref[...], 0.0)
    # Head: block-diagonal Linear(H2, 1) -> one output lane per packed batch row (8-lane-wide
    # store instead of a 1-lane store).
    o = jnp.dot(h.astype(jnp.bfloat16), w3_ref[...], preferred_element_type=jnp.float32)
    o_ref[...] = o + b3_ref[...]


def racing_predictor_forward(x, params, *, tile_packed_rows=1024):
    """x: (B, input_dim) f32.  params: dict of f32 arrays.  Returns (B, 1) f32."""
    B, D = x.shape
    H1 = params["w1"].shape[1]
    H2 = params["w2"].shape[1]

    # ---- Fold BN (running stats) + Linear bias into the Linear weights/biases ----
    s1 = params["g1"] * jax.lax.rsqrt(params["v1"] + EPS)
    s2 = params["g2"] * jax.lax.rsqrt(params["v2"] + EPS)
    w1f = params["w1"] * s1[None, :]
    b1f = (params["b1"] - params["m1"]) * s1 + params["be1"]
    w2f = params["w2"] * s2[None, :]
    b2f = (params["b2"] - params["m2"]) * s2 + params["be2"]

    # ---- Batch packing: P rows share one lane row; weights become block-diagonal ----
    P = max(1, min(8, 128 // max(D, 1)))          # 8 for the module's D=16
    eye = jnp.eye(P, dtype=jnp.float32)
    w1_bd = jnp.kron(eye, w1f).astype(jnp.bfloat16)              # (P*D,  P*H1)
    w2_bd = jnp.kron(eye, w2f).astype(jnp.bfloat16)              # (P*H1, P*H2)
    w3_bd = jnp.kron(eye, params["w3"]).astype(jnp.bfloat16)     # (P*H2, P)
    b1_bd = jnp.tile(b1f, P).reshape(1, P * H1).astype(jnp.float32)
    b2_bd = jnp.tile(b2f, P).reshape(1, P * H2).astype(jnp.float32)
    b3_bd = jnp.tile(params["b3"], P).reshape(1, P).astype(jnp.float32)

    # x (B, D) -> (Bp, P*D) is a free row-major reshape (no HBM pass).  Only B % P != 0
    # forces a small zero-pad copy; the padded rows' outputs are sliced off below.
    Bp = _cdiv(B, P)
    if Bp * P != B:
        x = jnp.concatenate([x, jnp.zeros((Bp * P - B, D), x.dtype)], axis=0)
    xp = x.reshape(Bp, P * D).astype(jnp.float32)

    # ---- Tile the packed batch.  Prefer big tiles (amortize ~0.35us/step), but keep >=2
    # grid steps when possible so the "parallel" axis can split across v7x's two TCs. ----
    tp = max(8, _round_up(int(tile_packed_rows), 8))
    if Bp < 16:
        tp = Bp                                   # single full-extent block (tiny batch)
    elif Bp <= tp:
        tp = max(8, _round_up(_cdiv(Bp, 2), 8))   # force >= 2 steps
    grid = (_cdiv(Bp, tp),)                       # partial last block handled by Pallas

    const = lambda i: (0, 0)
    flops = 2 * Bp * P * (D * H1 + H1 * H2 + H2)
    bytes_accessed = (Bp * P * D * 4 + Bp * P * 4
                      + (w1_bd.size + w2_bd.size + w3_bd.size) * 2
                      + (b1_bd.size + b2_bd.size + b3_bd.size) * 4)

    out = pl.pallas_call(
        _mlp_kernel,
        out_shape=jax.ShapeDtypeStruct((Bp, P), jnp.float32),
        grid=grid,
        in_specs=[
            pl.BlockSpec((tp, P * D), lambda i: (i, 0)),   # x tile (f32; bf16 cast in kernel)
            pl.BlockSpec((P * D, P * H1), const),          # block-diag folded W1 (bf16), resident
            pl.BlockSpec((1, P * H1), const),              # folded bias 1 (tiled x P)
            pl.BlockSpec((P * H1, P * H2), const),         # block-diag folded W2 (bf16), resident
            pl.BlockSpec((1, P * H2), const),              # folded bias 2 (tiled x P)
            pl.BlockSpec((P * H2, P), const),              # block-diag head W3 (bf16)
            pl.BlockSpec((1, P), const),                   # b3 (tiled x P)
        ],
        out_specs=pl.BlockSpec((tp, P), lambda i: (i, 0)),
        compiler_params=pltpu.CompilerParams(
            dimension_semantics=("parallel",),
            vmem_limit_bytes=32 * 1024 * 1024),
        cost_estimate=pl.CostEstimate(flops=flops, transcendentals=0,
                                      bytes_accessed=bytes_accessed),
    )(xp, w1_bd, b1_bd, w2_bd, b2_bd, w3_bd, b3_bd)
    # (Bp, P) row-major == original batch order; drop any padded rows.
    return out.reshape(Bp * P, 1)[:B]


def init_params(input_dim, hidden_dims=(64, 32), seed=0):
    """Deterministic synthetic parameter init (matches PyTorch module shapes)."""
    key = jax.random.PRNGKey(seed)
    dims = [input_dim] + list(hidden_dims)
    params = {}
    for i in range(len(hidden_dims)):
        key, kw, kb = jax.random.split(key, 3)
        fan_in, fan_out = dims[i], dims[i + 1]
        bound = 1.0 / jnp.sqrt(fan_in)
        params[f"w{i+1}"] = jax.random.uniform(kw, (fan_in, fan_out), jnp.float32, -bound, bound)
        params[f"b{i+1}"] = jax.random.uniform(kb, (fan_out,), jnp.float32, -bound, bound)
        params[f"g{i+1}"] = jnp.ones((fan_out,), jnp.float32)     # BN weight
        params[f"be{i+1}"] = jnp.zeros((fan_out,), jnp.float32)   # BN bias
        params[f"m{i+1}"] = jnp.zeros((fan_out,), jnp.float32)    # BN running mean
        params[f"v{i+1}"] = jnp.ones((fan_out,), jnp.float32)     # BN running var
    key, kw, kb = jax.random.split(key, 3)
    fan_in = dims[-1]
    bound = 1.0 / jnp.sqrt(fan_in)
    params["w3"] = jax.random.uniform(kw, (fan_in, 1), jnp.float32, -bound, bound)
    params["b3"] = jax.random.uniform(kb, (1,), jnp.float32, -bound, bound)
    return params


def reference_forward(x, params):
    """Pure-JAX f32 reference of the same (inference-mode) forward."""
    h = x @ params["w1"] + params["b1"]
    h = (h - params["m1"]) / jnp.sqrt(params["v1"] + EPS) * params["g1"] + params["be1"]
    h = jnp.maximum(h, 0.0)
    h = h @ params["w2"] + params["b2"]
    h = (h - params["m2"]) / jnp.sqrt(params["v2"] + EPS) * params["g2"] + params["be2"]
    h = jnp.maximum(h, 0.0)
    return h @ params["w3"] + params["b3"]


if __name__ == "__main__":
    input_dim = 16
    batch = 8
    hidden_dims = (64, 32)

    key = jax.random.PRNGKey(0)
    x = jax.random.normal(key, (batch, input_dim), dtype=jnp.float32)
    params = init_params(input_dim, hidden_dims, seed=0)

    out = racing_predictor_forward(x, params)
    jax.block_until_ready(out)

    ref = reference_forward(x, params)
    assert out.shape == (batch, 1), out.shape
    # bf16 matmul inputs (f32 accumulation) -> loosened tolerance vs the f32 reference.
    assert jnp.allclose(out, ref, atol=3e-2, rtol=3e-2), "mismatch vs reference"

    # TODO(synk): train-mode Dropout (stochastic) and batch-statistics BatchNorm are not
    # reproduced; this kernel implements eval/inference semantics.
    print("KERNEL_OK")
</pallas_src>

<mosaic_0001>
module attributes {stable_mosaic.version = 11 : i64} {
  func.func @_mlp_kernel(%arg0: i32, %arg1: memref<1x128xf32, #tpu.memory_space<vmem>>, %arg2: memref<128x512xbf16, #tpu.memory_space<vmem>>, %arg3: memref<1x512xf32, #tpu.memory_space<vmem>>, %arg4: memref<512x256xbf16, #tpu.memory_space<vmem>>, %arg5: memref<1x256xf32, #tpu.memory_space<vmem>>, %arg6: memref<256x8xbf16, #tpu.memory_space<vmem>>, %arg7: memref<1x8xf32, #tpu.memory_space<vmem>>, %arg8: memref<1x8xf32, #tpu.memory_space<vmem>>) attributes {dimension_semantics = [#tpu.dimension_semantics<parallel>], iteration_bounds = array<i64: 1>, scalar_prefetch = 0 : i64, scratch_operands = 0 : i64, tpu.core_type = #tpu.core_type<tc>, window_params = [{transform_indices = @transform_0, window_bounds = array<i64: 1, 128>}, {pipeline_mode = #tpu.pipeline_mode<synchronous>, transform_indices = @transform_1, window_bounds = array<i64: 128, 512>}, {pipeline_mode = #tpu.pipeline_mode<synchronous>, transform_indices = @transform_2, window_bounds = array<i64: 1, 512>}, {pipeline_mode = #tpu.pipeline_mode<synchronous>, transform_indices = @transform_3, window_bounds = array<i64: 512, 256>}, {pipeline_mode = #tpu.pipeline_mode<synchronous>, transform_indices = @transform_4, window_bounds = array<i64: 1, 256>}, {pipeline_mode = #tpu.pipeline_mode<synchronous>, transform_indices = @transform_5, window_bounds = array<i64: 256, 8>}, {pipeline_mode = #tpu.pipeline_mode<synchronous>, transform_indices = @transform_6, window_bounds = array<i64: 1, 8>}, {transform_indices = @transform_7, window_bounds = array<i64: 1, 8>}]} {
    %c0 = arith.constant 0 : index
    %c0_0 = arith.constant 0 : index
    %0 = vector.load %arg1[%c0, %c0_0] : memref<1x128xf32, #tpu.memory_space<vmem>>, vector<1x128xf32>
    %1 = arith.truncf %0 : vector<1x128xf32> to vector<1x128xbf16>
    %c0_1 = arith.constant 0 : index
    %c0_2 = arith.constant 0 : index
    %2 = vector.load %arg2[%c0_1, %c0_2] : memref<128x512xbf16, #tpu.memory_space<vmem>>, vector<128x512xbf16>
    %cst = arith.constant dense<0.000000e+00> : vector<1x512xf32>
    %3 = tpu.matmul %1, %2, %cst {dimension_numbers = #tpu.dot_dimension_numbers<[1], [0], [0], [1], [0, 0, 1, 1], [], []>} : vector<1x128xbf16>, vector<128x512xbf16>, vector<1x512xf32> -> vector<1x512xf32>
    %c0_3 = arith.constant 0 : index
    %c0_4 = arith.constant 0 : index
    %4 = vector.load %arg3[%c0_3, %c0_4] : memref<1x512xf32, #tpu.memory_space<vmem>>, vector<1x512xf32>
    %5 = arith.addf %3, %4 : vector<1x512xf32>
    %cst_5 = arith.constant 0.000000e+00 : f32
    %6 = vector.broadcast %cst_5 : f32 to vector<1x512xf32>
    %7 = arith.maximumf %5, %6 : vector<1x512xf32>
    %8 = arith.truncf %7 : vector<1x512xf32> to vector<1x512xbf16>
    %c0_6 = arith.constant 0 : index
    %c0_7 = arith.constant 0 : index
    %9 = vector.load %arg4[%c0_6, %c0_7] : memref<512x256xbf16, #tpu.memory_space<vmem>>, vector<512x256xbf16>
    %cst_8 = arith.constant dense<0.000000e+00> : vector<1x256xf32>
    %10 = tpu.matmul %8, %9, %cst_8 {dimension_numbers = #tpu.dot_dimension_numbers<[1], [0], [0], [1], [0, 0, 1, 1], [], []>} : vector<1x512xbf16>, vector<512x256xbf16>, vector<1x256xf32> -> vector<1x256xf32>
    %c0_9 = arith.constant 0 : index
    %c0_10 = arith.constant 0 : index
    %11 = vector.load %arg5[%c0_9, %c0_10] : memref<1x256xf32, #tpu.memory_space<vmem>>, vector<1x256xf32>
    %12 = arith.addf %10, %11 : vector<1x256xf32>
    %cst_11 = arith.constant 0.000000e+00 : f32
    %13 = vector.broadcast %cst_11 : f32 to vector<1x256xf32>
    %14 = arith.maximumf %12, %13 : vector<1x256xf32>
    %15 = arith.truncf %14 : vector<1x256xf32> to vector<1x256xbf16>
    %c0_12 = arith.constant 0 : index
    %c0_13 = arith.constant 0 : index
    %16 = vector.load %arg6[%c0_12, %c0_13] : memref<256x8xbf16, #tpu.memory_space<vmem>>, vector<256x8xbf16>
    %cst_14 = arith.constant dense<0.000000e+00> : vector<1x8xf32>
    %17 = tpu.matmul %15, %16, %cst_14 {dimension_numbers = #tpu.dot_dimension_numbers<[1], [0], [0], [1], [0, 0, 1, 1], [], []>} : vector<1x256xbf16>, vector<256x8xbf16>, vector<1x8xf32> -> vector<1x8xf32>
    %c0_15 = arith.constant 0 : index
    %c0_16 = arith.constant 0 : index
    %18 = vector.load %arg7[%c0_15, %c0_16] : memref<1x8xf32, #tpu.memory_space<vmem>>, vector<1x8xf32>
    %19 = arith.addf %17, %18 : vector<1x8xf32>
    %c0_17 = arith.constant 0 : index
    %c0_18 = arith.constant 0 : index
    %20 = vector.load %arg8[%c0_17, %c0_18] : memref<1x8xf32, #tpu.memory_space<vmem>>, vector<1x8xf32>
    tpu.vector_store %arg8[%c0_17, %c0_18], %19 {strides = array<i32>} : memref<1x8xf32, #tpu.memory_space<vmem>>, vector<1x8xf32>,
    return
  }
  func.func @transform_0(%arg0: i32) -> (i32, i32) {
    %c0_i32 = arith.constant 0 : i32
    %c0_i32_0 = arith.constant 0 : i32
    return %arg0, %c0_i32 : i32, i32
  }
  func.func @transform_1(%arg0: i32) -> (i32, i32) {
    %c0_i32 = arith.constant 0 : i32
    %c0_i32_0 = arith.constant 0 : i32
    %c0_i32_1 = arith.constant 0 : i32
    return %c0_i32, %c0_i32_0 : i32, i32
  }
  func.func @transform_2(%arg0: i32) -> (i32, i32) {
    %c0_i32 = arith.constant 0 : i32
    %c0_i32_0 = arith.constant 0 : i32
    %c0_i32_1 = arith.constant 0 : i32
    return %c0_i32, %c0_i32_0 : i32, i32
  }
  func.func @transform_3(%arg0: i32) -> (i32, i32) {
    %c0_i32 = arith.constant 0 : i32
    %c0_i32_0 = arith.constant 0 : i32
    %c0_i32_1 = arith.constant 0 : i32
    return %c0_i32, %c0_i32_0 : i32, i32
  }
  func.func @transform_4(%arg0: i32) -> (i32, i32) {
    %c0_i32 = arith.constant 0 : i32
    %c0_i32_0 = arith.constant 0 : i32
    %c0_i32_1 = arith.constant 0 : i32
    return %c0_i32, %c0_i32_0 : i32, i32
  }
  func.func @transform_5(%arg0: i32) -> (i32, i32) {
    %c0_i32 = arith.constant 0 : i32
    %c0_i32_0 = arith.constant 0 : i32
    %c0_i32_1 = arith.constant 0 : i32
    return %c0_i32, %c0_i32_0 : i32, i32
  }
  func.func @transform_6(%arg0: i32) -> (i32, i32) {
    %c0_i32 = arith.constant 0 : i32
    %c0_i32_0 = arith.constant 0 : i32
    %c0_i32_1 = arith.constant 0 : i32
    return %c0_i32, %c0_i32_0 : i32, i32
  }
  func.func @transform_7(%arg0: i32) -> (i32, i32) {
    %c0_i32 = arith.constant 0 : i32
    %c0_i32_0 = arith.constant 0 : i32
    return %arg0, %c0_i32 : i32, i32
  }
}

</mosaic_0001>

<bundles_post_ra>
// kernel: tpu_custom_call.1
= control target key start
LH: loop header
LB: loop body
LE: loop exit
PB: predicated region body
PF: predicated region fallthrough
CT: control target
= control target key end

     0   :  { %12 = vsyncpa [#allocation3], 0  ;;  %s1579_s0 = inlined_call_operand.vmem [shape: f32[1,128], index: 0, kind: input, shape index: {}]   ;;  %s1580_s1 = inlined_call_operand.hbm [shape: bf16[128,512], index: 1, kind: input, shape index: {}]   ;;  %s1581_s2 = inlined_call_operand.vmem [shape: f32[1,512], index: 2, kind: input, shape index: {}]   ;;  %s1582_s3 = inlined_call_operand.hbm [shape: bf16[512,256], index: 3, kind: input, shape index: {}]   ;;  %s1583_s4 = inlined_call_operand.vmem [shape: f32[1,256], index: 4, kind: input, shape index: {}]   ;;  %s1584_s5 = inlined_call_operand.vmem [shape: bf16[256,8], index: 5, kind: input, shape index: {}]   ;;  %s1585_s6 = inlined_call_operand.vmem [shape: f32[1,8], index: 6, kind: input, shape index: {}]   ;;  %s1586_s7 = inlined_call_operand.hbm [shape: f32[1,8], index: 7, kind: output, shape index: {}]  }
   0x1   :  { %13 = vsyncpa [#allocation6], 0 }
   0x2   :  { %14 = vsyncpa [#allocation4], 0  ;;  %s1411_s24 = smov [#allocation2]   ;;  %s1339_s28 = scalar_lea.hbm %s1580_s1, 4096 }
   0x3   :  { %s22_s25 = sshll.u32 %s1411_s24, 4  ;;  %p1340_p0 = scmp.ne.s32.totalorder %s1580_s1, %s1339_s28  ;;  %s23_s25 = int_to_ptr.vmem [resolvable:$true] %s22_s25 }
   0x4   :  { %p1343_p1 = scmp.lt.u32.totalorder %s1339_s28, %s1580_s1 }
   0x6   :  { %p1345_p2 = pnand %p1343_p1, %p1340_p0 }
   0x8   :  { %1348 = shalt.err (!%p1345_p2)
}
   0x9   :  { %s1349_s10 = scalar_lea.vmem %s23_s25, 4096  ;;  %p1354_p4 = scmp.lt.s32.totalorder %s23_s25, %s23_s25 }
   0xa   :  { %p1350_p3 = scmp.ne.s32.totalorder %s23_s25, %s1349_s10  ;;  %p1355_p5 = scmp.lt.s32.totalorder %s1349_s10, %s1349_s10 }
   0xc   :  { %p1356_p6 = por %p1355_p5, %p1354_p4 }
   0xe   :  { %p1357_p7 = pnand %p1356_p6, %p1350_p3 }
  0x10   :  { %1360 = shalt.err (!%p1357_p7)
}
  0x11   :  { %s1412_s11 = smov 256   ;;  %s1413_s12 = smov 16  }
  0x12   :  { %28 = dma.hbm_to_vmem [thread:$0]  %s1580_s1, 4096, %s23_s25, [#allocation3], %s1412_s11, %s1412_s11, %s1413_s12  }
  0x13   :  { %s1414_s15 = smov [#allocation5]   ;;  %s1361_s19 = scalar_lea.hbm %s1582_s3, 8192 }
  0x14   :  { %s36_s16 = sshll.u32 %s1414_s15, 4  ;;  %p1362_p8 = scmp.ne.s32.totalorder %s1582_s3, %s1361_s19  ;;  %s37_s16 = int_to_ptr.vmem [resolvable:$true] %s36_s16 }
  0x15   :  { %p1365_p9 = scmp.lt.u32.totalorder %s1361_s19, %s1582_s3 }
  0x17   :  { %p1367_p10 = pnand %p1365_p9, %p1362_p8 }
  0x19   :  { %1370 = shalt.err (!%p1367_p10)
}
  0x1a   :  { %s1371_s24 = scalar_lea.vmem %s37_s16, 8192  ;;  %p1376_p12 = scmp.lt.s32.totalorder %s37_s16, %s37_s16 }
  0x1b   :  { %p1372_p11 = scmp.ne.s32.totalorder %s37_s16, %s1371_s24  ;;  %p1377_p13 = scmp.lt.s32.totalorder %s1371_s24, %s1371_s24 }
  0x1d   :  { %p1378_p0 = por %p1377_p13, %p1376_p12 }
  0x1f   :  { %p1379_p1 = pnand %p1378_p0, %p1372_p11 }
  0x21   :  { %1382 = shalt.err (!%p1379_p1)
}
  0x22   :  { %s1415_s1 = smov 128   ;;  %s1416_s25 = smov 8  }
  0x23   :  { %42 = dma.hbm_to_vmem [thread:$0]  %s1582_s3, 8192, %s37_s16, [#allocation6], %s1415_s1, %s1415_s1, %s1416_s25  }
  0x24   :  { %1405 = dma.done.wait [#allocation3], 4096  }
  0x25   :  { %1406 = vsyncadd [#allocation3], 4294963200 }
  0x26   :  { %1407 = dma.done.wait [#allocation6], 8192  }
  0x27   :  { %1408 = vsyncadd [#allocation6], 4294959104  ;;  %v1417_v0 = vmov 0   ;;  %v1179_v1 = vld [vmem:[#allocation2 + $0x4] ss:$16 sps:$4 sm:$0xff]   ;;  %s1418_s14 = smov [#allocation7]  }
  0x28   :  { %304 = vmatprep.mubr.bf16.mxu1 %v1417_v0  ;;  %v1181_v2 = vld [vmem:[#allocation2] ss:$16 sps:$4 sm:$0xff]   ;;  %272 = vmatprep.subr.bf16.mxu1 %v1179_v1  ;;  %v1182_v3 = vld [vmem:[#allocation2 + $0x24] ss:$16 sps:$4 sm:$0xff]   ;;  %v1205_v23 = vld [vmem:[#allocation2 + $0xc] ss:$16 sps:$4 sm:$0xff]  }
  0x29   :  { %273 = vmatpush1.bf16.msra.mxu1 %v1181_v2  ;;  %v1184_v4 = vld [vmem:[#allocation2 + $0x20] ss:$16 sps:$4 sm:$0xff]   ;;  %v1185_v5 = vld [vmem:[#allocation2 + $0x44] ss:$16 sps:$4 sm:$0xff]   ;;  %v1203_v27 = vld [vmem:[#allocation2 + $0x8] ss:$16 sps:$4 sm:$0xff]  }
  0x2a   :  { %274 = vmatprep.subr.bf16.mxu1 %v1182_v3  ;;  %v1187_v6 = vld [vmem:[#allocation2 + $0x40] ss:$16 sps:$4 sm:$0xff]   ;;  %v1188_v7 = vld [vmem:[#allocation2 + $0x64] ss:$16 sps:$4 sm:$0xff]   ;;  %v1208_v28 = vld [vmem:[#allocation2 + $0x2c] ss:$16 sps:$4 sm:$0xff]  }
  0x2b   :  { %v1190_v8 = vld [vmem:[#allocation2 + $0x60] ss:$16 sps:$4 sm:$0xff]   ;;  %v1191_v9 = vld [vmem:[#allocation2 + $0x84] ss:$16 sps:$4 sm:$0xff]   ;;  %v1206_v31 = vld [vmem:[#allocation2 + $0x28] ss:$16 sps:$4 sm:$0xff]  }
  0x2c   :  { %v1193_v10 = vld [vmem:[#allocation2 + $0x80] ss:$16 sps:$4 sm:$0xff]   ;;  %v1194_v11 = vld [vmem:[#allocation2 + $0xa4] ss:$16 sps:$4 sm:$0xff]   ;;  %v1211_v32 = vld [vmem:[#allocation2 + $0x4c] ss:$16 sps:$4 sm:$0xff]  }
  0x2d   :  { %275 = vmatpush1.bf16.msra.mxu1 %v1184_v4  ;;  %v1196_v12 = vld [vmem:[#allocation2 + $0xa0] ss:$16 sps:$4 sm:$0xff]   ;;  %v1197_v13 = vld [vmem:[#allocation2 + $0xc4] ss:$16 sps:$4 sm:$0xff]   ;;  %v1209_v34 = vld [vmem:[#allocation2 + $0x48] ss:$16 sps:$4 sm:$0xff]  }
  0x2e   :  { %276 = vmatprep.subr.bf16.mxu1 %v1185_v5  ;;  %v1199_v14 = vld [vmem:[#allocation2 + $0xc0] ss:$16 sps:$4 sm:$0xff]   ;;  %v1227_v15 = vld [vmem:[#allocation5 + $0x4] ss:$8 sps:$4 sm:$0xff]   ;;  %v1230_v17 = vld [vmem:[#allocation5 + $0x14] ss:$8 sps:$4 sm:$0xff]  }
  0x2f   :  { %v1229_v16 = vld [vmem:[#allocation5] ss:$8 sps:$4 sm:$0xff]   ;;  %v1200_v18 = vld [vmem:[#allocation2 + $0xe4] ss:$16 sps:$4 sm:$0xff]   ;;  %758 = vmatprep.subr.bf16.mxu0 %v1227_v15  ;;  %v1232_v19 = vld [vmem:[#allocation5 + $0x10] ss:$8 sps:$4 sm:$0xff]  }
  0x30   :  { %759 = vmatpush1.bf16.msra.mxu0 %v1229_v16  ;;  %v1202_v20 = vld [vmem:[#allocation2 + $0xe0] ss:$16 sps:$4 sm:$0xff]   ;;  %v1233_v21 = vld [vmem:[#allocation5 + $0x24] ss:$8 sps:$4 sm:$0xff]   ;;  %v1236_v26 = vld [vmem:[#allocation5 + $0x34] ss:$8 sps:$4 sm:$0xff]   ;;  %v252_v16 = vlaneseq }
  0x31   :  { %277 = vmatpush1.bf16.msra.mxu1 %v1187_v6  ;;  %760 = vmatprep.subr.bf16.mxu0 %v1230_v17  ;;  %v56_v22 = vld [vmem:[%s1579_s0] sm:$0x1]  ;;  %v1238_v29 = vld [vmem:[#allocation5 + $0x30] ss:$8 sps:$4 sm:$0xff]   ;;  %v1239_v30 = vld [vmem:[#allocation5 + $0x44] ss:$8 sps:$4 sm:$0xff]  }
  0x32   :  { %278 = vmatprep.subr.bf16.mxu1 %v1188_v7  ;;  %v1235_v24 = vld [vmem:[#allocation5 + $0x20] ss:$8 sps:$4 sm:$0xff]   ;;  %v1486_v25 = vpack.c.bf16 %v56_v22, %v56_v22  ;;  %v1242_v35 = vld [vmem:[#allocation5 + $0x54] ss:$8 sps:$4 sm:$0xff]   ;;  %v1244_v37 = vld [vmem:[#allocation5 + $0x50] ss:$8 sps:$4 sm:$0xff]  }
  0x33   :  { %v1241_v33 = vld [vmem:[#allocation5 + $0x40] ss:$8 sps:$4 sm:$0xff]   ;;  %v1214_v36 = vld [vmem:[#allocation2 + $0x6c] ss:$16 sps:$4 sm:$0xff]   ;;  %v1250_v45 = vld [vmem:[#allocation5 + $0x70] ss:$8 sps:$4 sm:$0xff]  }
  0x34   :  { %761 = vmatpush1.bf16.msra.mxu0 %v1232_v19  ;;  %v1245_v38 = vld [vmem:[#allocation5 + $0x64] ss:$8 sps:$4 sm:$0xff]   ;;  %v1212_v39 = vld [vmem:[#allocation2 + $0x68] ss:$16 sps:$4 sm:$0xff]   ;;  %v1248_v42 = vld [vmem:[#allocation5 + $0x74] ss:$8 sps:$4 sm:$0xff]  }
  0x35   :  { %279 = vmatpush1.bf16.msra.mxu1 %v1190_v8  ;;  %762 = vmatprep.subr.bf16.mxu0 %v1233_v21  ;;  %v1217_v40 = vld [vmem:[#allocation2 + $0x8c] ss:$16 sps:$4 sm:$0xff]   ;;  %v1247_v41 = vld [vmem:[#allocation5 + $0x60] ss:$8 sps:$4 sm:$0xff]   ;;  %v1256_v53 = vld [vmem:[#allocation5 + $0x90] ss:$8 sps:$4 sm:$0xff]  }
  0x36   :  { %280 = vmatprep.subr.bf16.mxu1 %v1191_v9  ;;  %v1215_v43 = vld [vmem:[#allocation2 + $0x88] ss:$16 sps:$4 sm:$0xff]   ;;  %v1220_v44 = vld [vmem:[#allocation2 + $0xac] ss:$16 sps:$4 sm:$0xff]   ;;  %v1323_v4 = vld [vmem:[%s1584_s5 + $0x40] sm:$0xff]   ;;  %v1526_v17 = vshrl.u32 %v252_v16, 7 }
  0x37   :  { %v1251_v46 = vld [vmem:[#allocation5 + $0x84] ss:$8 sps:$4 sm:$0xff]   ;;  %v1218_v47 = vld [vmem:[#allocation2 + $0xa8] ss:$16 sps:$4 sm:$0xff]   ;;  %v1254_v50 = vld [vmem:[#allocation5 + $0x94] ss:$8 sps:$4 sm:$0xff]  }
  0x38   :  { %763 = vmatpush1.bf16.msra.mxu0 %v1235_v24  ;;  %v1223_v48 = vld [vmem:[#allocation2 + $0xcc] ss:$16 sps:$4 sm:$0xff]   ;;  %v1253_v49 = vld [vmem:[#allocation5 + $0x80] ss:$8 sps:$4 sm:$0xff]   ;;  %v1262_v58 = vld [vmem:[#allocation5 + $0xb0] ss:$8 sps:$4 sm:$0xff]  }
  0x39   :  { %281 = vmatpush1.bf16.msra.mxu1 %v1193_v10  ;;  %764 = vmatprep.subr.bf16.mxu0 %v1236_v26  ;;  %v1221_v51 = vld [vmem:[#allocation2 + $0xc8] ss:$16 sps:$4 sm:$0xff]   ;;  %v1226_v52 = vld [vmem:[#allocation2 + $0xec] ss:$16 sps:$4 sm:$0xff]   ;;  %v1324_v5 = vld [vmem:[%s1584_s5] sm:$0xff]   ;;  %s1021_s15 = sshll.u32 %s1418_s14, 4  ;;  %s1022_s15 = int_to_ptr.vmem [resolvable:$true] %s1021_s15 }
  0x3a   :  { %282 = vmatprep.subr.bf16.mxu1 %v1194_v11  ;;  %v1257_v54 = vld [vmem:[#allocation5 + $0xa4] ss:$8 sps:$4 sm:$0xff]   ;;  %v1224_v55 = vld [vmem:[#allocation2 + $0xe8] ss:$16 sps:$4 sm:$0xff]   ;;  %v1260_v57 = vld [vmem:[#allocation5 + $0xb4] ss:$8 sps:$4 sm:$0xff]   ;;  %p1388_p3 = scmp.lt.s32.totalorder %s1022_s15, %s1022_s15 }
  0x3b   :  { %v1259_v56 = vld [vmem:[#allocation5 + $0xa0] ss:$8 sps:$4 sm:$0xff]   ;;  %v1263_v59 = vld [vmem:[#allocation5 + $0xc4] ss:$8 sps:$4 sm:$0xff]   ;;  %v1266_v61 = vld [vmem:[#allocation5 + $0xd4] ss:$8 sps:$4 sm:$0xff]  }
  0x3c   :  { %765 = vmatpush1.bf16.msra.mxu0 %v1238_v29  ;;  %v1265_v60 = vld [vmem:[#allocation5 + $0xc0] ss:$8 sps:$4 sm:$0xff]   ;;  %v1268_v62 = vld [vmem:[#allocation5 + $0xd0] ss:$8 sps:$4 sm:$0xff]   ;;  %v1269_v63 = vld [vmem:[#allocation5 + $0xe4] ss:$8 sps:$4 sm:$0xff]  }
  0x3d   :  { %283 = vmatpush1.bf16.msra.mxu1 %v1196_v12  ;;  %766 = vmatprep.subr.bf16.mxu0 %v1239_v30  ;;  %v1272_v1 = vld [vmem:[#allocation5 + $0xf4] ss:$8 sps:$4 sm:$0xff]   ;;  %v1274_v2 = vld [vmem:[#allocation5 + $0xf0] ss:$8 sps:$4 sm:$0xff]   ;;  %v1277_v3 = vld [vmem:[#allocation5 + $0x104] ss:$8 sps:$4 sm:$0xff]  }
  0x3e   :  { %284 = vmatprep.subr.bf16.mxu1 %v1197_v13  ;;  %v1325_v6 = vld [vmem:[%s1584_s5 + $0x48] sm:$0xff]   ;;  %v1327_v8 = vld [vmem:[%s1584_s5 + $0x50] sm:$0xff]   ;;  %v1329_v10 = vld [vmem:[%s1584_s5 + $0x58] sm:$0xff]   ;;  %vm1013_vm0 = vcmask 57344   ;;  %s1383_s16 = scalar_lea.vmem %s1022_s15, 16  ;;  %s1387_s17 = scalar_lea.vmem %s1022_s15, 32 }
  0x3f   :  { %v1326_v7 = vld [vmem:[%s1584_s5 + $0x8] sm:$0xff]   ;;  %v1328_v9 = vld [vmem:[%s1584_s5 + $0x10] sm:$0xff]   ;;  %v1330_v11 = vld [vmem:[%s1584_s5 + $0x18] sm:$0xff]   ;;  %p1384_p2 = scmp.ne.s32.totalorder %s1022_s15, %s1383_s16  ;;  %p1389_p4 = scmp.lt.s32.totalorder %s1387_s17, %s1383_s16 }
  0x40   :  { %767 = vmatpush1.bf16.msra.mxu0 %v1241_v33  ;;  %v1331_v12 = vld [vmem:[%s1584_s5 + $0x60] sm:$0xff]   ;;  %v1334_v15 = vld [vmem:[%s1584_s5 + $0x28] sm:$0xff]   ;;  %v1337_v16 = vld [vmem:[%s1584_s5 + $0x78] sm:$0xff]  }
  0x41   :  { %285 = vmatpush1.bf16.msra.mxu1 %v1199_v14  ;;  %768 = vmatprep.subr.bf16.mxu0 %v1242_v35  ;;  %v1332_v13 = vld [vmem:[%s1584_s5 + $0x20] sm:$0xff]   ;;  %v1333_v14 = vld [vmem:[%s1584_s5 + $0x68] sm:$0xff]   ;;  %v1278_v35 = vld [vmem:[#allocation5 + $0x110] ss:$8 sps:$4 sm:$0xff]   ;;  %p1390_p5 = por %p1389_p4, %p1388_p3 }
  0x42   :  { %286 = vmatprep.subr.bf16.mxu1 %v1200_v18  ;;  %v254_v18 = vsub.s32 0, %v1526_v17  ;;  %v1532_v19 = vld [vmem:[%s1581_s2] sm:$0xf] }
  0x43   :  { %p1391_p6 = pnand %p1390_p5, %p1384_p2 }
  0x44   :  { %769 = vmatpush1.bf16.msra.mxu0 %v1244_v37  ;;  %v255_v21 = vrot.slane %v1532_v19, %v254_v18  ;;  %v1281_v37 = vld [vmem:[#allocation5 + $0x120] ss:$8 sps:$4 sm:$0xff]  }
  0x45   :  { %287 = vmatpush1.bf16.msra.mxu1 %v1202_v20  ;;  %770 = vmatprep.subr.bf16.mxu0 %v1245_v38  ;;  %v258_v20 = vsub.s32 1, %v1526_v17  ;;  %v1286_v38 = vld [vmem:[#allocation5 + $0x134] ss:$8 sps:$4 sm:$0xff]  }
  0x46   :  { %313 = vmatprep.subr.bf16.mxu1 %v1205_v23 }
  0x47   :  { %v259_v22 = vrot.slane %v1532_v19, %v258_v20 }
  0x48   :  { %305 = vmatmul.mubr.bf16.vlgmr.msra.gmra.mrb[0].mxu1 %v1486_v25  ;;  %771 = vmatpush1.bf16.msra.mxu0 %v1247_v41  ;;  %v1287_v41 = vld [vmem:[#allocation5 + $0x140] ss:$8 sps:$4 sm:$0xff]  }
  0x49   :  { %314 = vmatpush1.bf16.msra.mxu1 %v1203_v27  ;;  %345 = vmatprep.mubr.bf16.mxu1 %v1417_v0  ;;  %v1271_v0 = vld [vmem:[#allocation5 + $0xe0] ss:$8 sps:$4 sm:$0xff]  }
  0x4a   :  { %315 = vmatprep.subr.bf16.mxu1 %v1208_v28  ;;  %772 = vmatprep.subr.bf16.mxu0 %v1248_v42  ;;  %v1292_v42 = vld [vmem:[#allocation5 + $0x154] ss:$8 sps:$4 sm:$0xff]  }
  0x4c   :  { %773 = vmatpush1.bf16.msra.mxu0 %v1250_v45  ;;  %v1295_v45 = vld [vmem:[#allocation5 + $0x164] ss:$8 sps:$4 sm:$0xff]  }
  0x4d   :  { %316 = vmatpush1.bf16.msra.mxu1 %v1206_v31  ;;  %774 = vmatprep.subr.bf16.mxu0 %v1251_v46  ;;  %v1293_v46 = vld [vmem:[#allocation5 + $0x160] ss:$8 sps:$4 sm:$0xff]  }
  0x4e   :  { %317 = vmatprep.subr.bf16.mxu1 %v1211_v32  ;;  %v1275_v32 = vld [vmem:[#allocation5 + $0x100] ss:$8 sps:$4 sm:$0xff]  }
  0x50   :  { %775 = vmatpush1.bf16.msra.mxu0 %v1253_v49 }
  0x51   :  { %318 = vmatpush1.bf16.msra.mxu1 %v1209_v34  ;;  %776 = vmatprep.subr.bf16.mxu0 %v1254_v50  ;;  %v1280_v34 = vld [vmem:[#allocation5 + $0x114] ss:$8 sps:$4 sm:$0xff]  }
  0x52   :  { %319 = vmatprep.subr.bf16.mxu1 %v1214_v36  ;;  %v1283_v36 = vld [vmem:[#allocation5 + $0x124] ss:$8 sps:$4 sm:$0xff]  }
  0x54   :  { %777 = vmatpush1.bf16.msra.mxu0 %v1256_v53 }
  0x55   :  { %320 = vmatpush1.bf16.msra.mxu1 %v1212_v39  ;;  %778 = vmatprep.subr.bf16.mxu0 %v1257_v54  ;;  %v1284_v39 = vld [vmem:[#allocation5 + $0x130] ss:$8 sps:$4 sm:$0xff]   ;;  %v1301_v54 = vld [vmem:[#allocation5 + $0x184] ss:$8 sps:$4 sm:$0xff]  }
  0x56   :  { %321 = vmatprep.subr.bf16.mxu1 %v1217_v40  ;;  %v1289_v40 = vld [vmem:[#allocation5 + $0x144] ss:$8 sps:$4 sm:$0xff]  }
  0x58   :  { %779 = vmatpush1.bf16.msra.mxu0 %v1259_v56 }
  0x59   :  { %322 = vmatpush1.bf16.msra.mxu1 %v1215_v43  ;;  %780 = vmatprep.subr.bf16.mxu0 %v1260_v57  ;;  %v1290_v43 = vld [vmem:[#allocation5 + $0x150] ss:$8 sps:$4 sm:$0xff]   ;;  %v1299_v57 = vld [vmem:[#allocation5 + $0x180] ss:$8 sps:$4 sm:$0xff]  }
  0x5a   :  { %323 = vmatprep.subr.bf16.mxu1 %v1220_v44  ;;  %v266_v44 = vsub.s32 3, %v1526_v17 }
  0x5c   :  { %781 = vmatpush1.bf16.msra.mxu0 %v1262_v58 }
  0x5d   :  { %324 = vmatpush1.bf16.msra.mxu1 %v1218_v47  ;;  %782 = vmatprep.subr.bf16.mxu0 %v1263_v59  ;;  %v267_v47 = vrot.slane %v1532_v19, %v266_v44  ;;  %v1304_v59 = vld [vmem:[#allocation5 + $0x194] ss:$8 sps:$4 sm:$0xff]  }
  0x5e   :  { %325 = vmatprep.subr.bf16.mxu1 %v1223_v48  ;;  %v1298_v48 = vld [vmem:[#allocation5 + $0x174] ss:$8 sps:$4 sm:$0xff]  }
  0x60   :  { %783 = vmatpush1.bf16.msra.mxu0 %v1265_v60  ;;  %v1302_v60 = vld [vmem:[#allocation5 + $0x190] ss:$8 sps:$4 sm:$0xff]  }
  0x61   :  { %326 = vmatpush1.bf16.msra.mxu1 %v1221_v51  ;;  %784 = vmatprep.subr.bf16.mxu0 %v1266_v61  ;;  %v1296_v51 = vld [vmem:[#allocation5 + $0x170] ss:$8 sps:$4 sm:$0xff]   ;;  %v1307_v61 = vld [vmem:[#allocation5 + $0x1a4] ss:$8 sps:$4 sm:$0xff]  }
  0x62   :  { %327 = vmatprep.subr.bf16.mxu1 %v1226_v52 }
  0x64   :  { %785 = vmatpush1.bf16.msra.mxu0 %v1268_v62  ;;  %v1305_v62 = vld [vmem:[#allocation5 + $0x1a0] ss:$8 sps:$4 sm:$0xff]  }
  0x65   :  { %328 = vmatpush1.bf16.msra.mxu1 %v1224_v55  ;;  %786 = vmatprep.subr.bf16.mxu0 %v1269_v63  ;;  %v1310_v63 = vld [vmem:[#allocation5 + $0x1b4] ss:$8 sps:$4 sm:$0xff]  }
  0x66   :  { %1143 = vmatprep.subr.bf16.mxu1 %v1323_v4  ;;  %v1316_v4 = vld [vmem:[#allocation5 + $0x1d4] ss:$8 sps:$4 sm:$0xff]  }
  0x68   :  { %346 = vmatmul.mubr.bf16.vlgmr.msra.gmra.mrb[4].mxu1 %v1486_v25  ;;  %787 = vmatpush1.bf16.msra.mxu0 %v1271_v0  ;;  %v1308_v0 = vld [vmem:[#allocation5 + $0x1b0] ss:$8 sps:$4 sm:$0xff]  }
  0x69   :  { %788 = vmatprep.subr.bf16.mxu0 %v1272_v1  ;;  %1144 = vmatpush3.bf16.msra.mxu1 %v1324_v5  ;;  %v1313_v1 = vld [vmem:[#allocation5 + $0x1c4] ss:$8 sps:$4 sm:$0xff]   ;;  %v1314_v5 = vld [vmem:[#allocation5 + $0x1d0] ss:$8 sps:$4 sm:$0xff]  }
  0x6a   :  { %1145 = vmatprep.subr.bf16.mxu1 %v1325_v6 }
  0x6c   :  { %789 = vmatpush1.bf16.msra.mxu0 %v1274_v2  ;;  %v1311_v2 = vld [vmem:[#allocation5 + $0x1c0] ss:$8 sps:$4 sm:$0xff]  }
  0x6d   :  { %799 = vmatprep.subr.bf16.mxu0 %v1277_v3  ;;  %1146 = vmatpush3.bf16.msra.mxu1 %v1326_v7  ;;  %v262_v3 = vsub.s32 2, %v1526_v17  ;;  %v1319_v7 = vld [vmem:[#allocation5 + $0x1e4] ss:$8 sps:$4 sm:$0xff]  }
  0x6e   :  { %1147 = vmatprep.subr.bf16.mxu1 %v1327_v8  ;;  %v1317_v8 = vld [vmem:[#allocation5 + $0x1e0] ss:$8 sps:$4 sm:$0xff]  }
  0x6f   :  { %v263_v6 = vrot.slane %v1532_v19, %v262_v3  ;;  %v1338_v19 = vld [vmem:[%s1584_s5 + $0x38] sm:$0xff]  }
  0x71   :  { %1148 = vmatpush3.bf16.msra.mxu1 %v1328_v9 }
  0x72   :  { %1149 = vmatprep.subr.bf16.mxu1 %v1329_v10  ;;  %v1322_v10 = vld [vmem:[#allocation5 + $0x1f4] ss:$8 sps:$4 sm:$0xff]  }
  0x75   :  { %1150 = vmatpush3.bf16.msra.mxu1 %v1330_v11  ;;  %v1320_v11 = vld [vmem:[#allocation5 + $0x1f0] ss:$8 sps:$4 sm:$0xff]  }
  0x76   :  { %1151 = vmatprep.subr.bf16.mxu1 %v1331_v12 }
  0x79   :  { %1152 = vmatpush3.bf16.msra.mxu1 %v1332_v13 }
  0x7a   :  { %1153 = vmatprep.subr.bf16.mxu1 %v1333_v14  ;;  %v1335_v14 = vld [vmem:[%s1584_s5 + $0x70] sm:$0xff]  }
  0x7d   :  { %1154 = vmatpush3.bf16.msra.mxu1 %v1334_v15  ;;  %v1336_v15 = vld [vmem:[%s1584_s5 + $0x30] sm:$0xff]  }
  0x7e   :  { %1155 = vmatprep.subr.bf16.mxu1 %v1335_v14 }
  0x81   :  { %1156 = vmatpush3.bf16.msra.mxu1 %v1336_v15 }
  0x82   :  { %1157 = vmatprep.subr.bf16.mxu1 %v1337_v16 }
  0x85   :  { %1158 = vmatpush3.bf16.msra.mxu1 %v1338_v19 }
 0x11b   :  { %v306_v23 = vpop.f32.mrb[0].mxu1 }
 0x11c   :  { %v307_v24 = vadd.f32 %v306_v23, %v255_v21  ;;  %v308_v25 = vpop.f32.mrb[1].mxu1  ;;  %v426_v21 = vld [vmem:[%s1583_s4] sm:$0x3] }
 0x11d   :  { %v309_v26 = vadd.f32 %v308_v25, %v259_v22  ;;  %v310_v27 = vpop.f32.mrb[2].mxu1  ;;  %v751_v22 = vrot.slane %v426_v21, %v254_v18  ;;  %v755_v23 = vrot.slane %v426_v21, %v258_v20  ;;  %v876_v18 = vld [vmem:[%s1585_s6] sm:$0x1] }
 0x11e   :  { %v354_v28 = vmax.f32 %v307_v24, 0.0  ;;  %v311_v29 = vpop.f32.mrb[3].mxu1 }
 0x11f   :  { %v355_v30 = vmax.f32 %v309_v26, 0.0 }
 0x120   :  { %v358_v33 = vpack.c.bf16 %v354_v28, %v354_v28 }
 0x121   :  { %v359_v31 = vpack.c.bf16 %v355_v30, %v355_v30 }
 0x123   :  { %790 = vmatprep.mubr.bf16.mxu0 %v359_v31 }
 0x124   :  { %791 = vmatmul.mubr.bf16.vlgmr.msra.gmra.mrb[0].mxu0 %v358_v33 }
 0x125   :  { %800 = vmatpush1.bf16.msra.mxu0 %v1275_v32 }
 0x126   :  { %801 = vmatprep.subr.bf16.mxu0 %v1280_v34 }
 0x129   :  { %802 = vmatpush1.bf16.msra.mxu0 %v1278_v35 }
 0x12a   :  { %803 = vmatprep.subr.bf16.mxu0 %v1283_v36 }
 0x12d   :  { %804 = vmatpush1.bf16.msra.mxu0 %v1281_v37 }
 0x12e   :  { %805 = vmatprep.subr.bf16.mxu0 %v1286_v38 }
 0x131   :  { %806 = vmatpush1.bf16.msra.mxu0 %v1284_v39 }
 0x132   :  { %807 = vmatprep.subr.bf16.mxu0 %v1289_v40 }
 0x135   :  { %808 = vmatpush1.bf16.msra.mxu0 %v1287_v41 }
 0x136   :  { %809 = vmatprep.subr.bf16.mxu0 %v1292_v42 }
 0x139   :  { %810 = vmatpush1.bf16.msra.mxu0 %v1290_v43 }
 0x13a   :  { %811 = vmatprep.subr.bf16.mxu0 %v1295_v45 }
 0x13b   :  { %v347_v49 = vpop.f32.mrb[4].mxu1 }
 0x13c   :  { %v349_v50 = vpop.f32.mrb[5].mxu1  ;;  %v348_v9 = vadd.f32 %v347_v49, %v263_v6 }
 0x13d   :  { %812 = vmatpush1.bf16.msra.mxu0 %v1293_v46  ;;  %v350_v52 = vadd.f32 %v349_v50, %v267_v47  ;;  %v351_v53 = vpop.f32.mrb[6].mxu1 }
 0x13e   :  { %813 = vmatprep.subr.bf16.mxu0 %v1298_v48  ;;  %v352_v55 = vpop.f32.mrb[7].mxu1  ;;  %v356_v12 = vmax.f32 %v348_v9, 0.0 }
 0x13f   :  { %v357_v56 = vmax.f32 %v350_v52, 0.0 }
 0x140   :  { %v360_v13 = vpack.c.bf16 %v356_v12, %v356_v12 }
 0x141   :  { %814 = vmatpush1.bf16.msra.mxu0 %v1296_v51  ;;  %v361_v58 = vpack.c.bf16 %v357_v56, %v357_v56 }
 0x142   :  { %815 = vmatprep.subr.bf16.mxu0 %v1301_v54 }
 0x143   :  { %831 = vmatprep.mubr.bf16.mxu0 %v361_v58 }
 0x145   :  { %816 = vmatpush1.bf16.msra.mxu0 %v1299_v57 }
 0x146   :  { %817 = vmatprep.subr.bf16.mxu0 %v1304_v59 }
 0x149   :  { %818 = vmatpush1.bf16.msra.mxu0 %v1302_v60 }
 0x14a   :  { %819 = vmatprep.subr.bf16.mxu0 %v1307_v61 }
 0x14d   :  { %820 = vmatpush1.bf16.msra.mxu0 %v1305_v62 }
 0x14e   :  { %821 = vmatprep.subr.bf16.mxu0 %v1310_v63 }
 0x151   :  { %822 = vmatpush1.bf16.msra.mxu0 %v1308_v0 }
 0x152   :  { %823 = vmatprep.subr.bf16.mxu0 %v1313_v1 }
 0x155   :  { %824 = vmatpush1.bf16.msra.mxu0 %v1311_v2 }
 0x156   :  { %825 = vmatprep.subr.bf16.mxu0 %v1316_v4 }
 0x159   :  { %826 = vmatpush1.bf16.msra.mxu0 %v1314_v5 }
 0x15a   :  { %827 = vmatprep.subr.bf16.mxu0 %v1319_v7 }
 0x15d   :  { %828 = vmatpush1.bf16.msra.mxu0 %v1317_v8 }
 0x15e   :  { %829 = vmatprep.subr.bf16.mxu0 %v1322_v10 }
 0x161   :  { %830 = vmatpush1.bf16.msra.mxu0 %v1320_v11 }
 0x164   :  { %832 = vmatmul.mubr.bf16.vlgmr.msra.gmra.mrb[0].mxu0 %v360_v13 }
 0x237   :  { %v833_v24 = vpop.f32.mrb[0].mxu0 }
 0x238   :  { %v1165_v25 = vadd.f32 %v833_v24, %v751_v22  ;;  %v835_v26 = vpop.f32.mrb[1].mxu0 }
 0x239   :  { %v1166_v27 = vadd.f32 %v835_v26, %v755_v23  ;;  %v837_v28 = vpop.f32.mrb[2].mxu0 }
 0x23a   :  { %v840_v29 = vmax.f32 %v1165_v25, 0.0  ;;  %v838_v30 = vpop.f32.mrb[3].mxu0 }
 0x23b   :  { %v841_v31 = vmax.f32 %v1166_v27, 0.0 }
 0x23c   :  { %v842_v33 = vpack.c.bf16 %v840_v29, %v840_v29 }
 0x23d   :  { %v843_v32 = vpack.c.bf16 %v841_v31, %v841_v31 }
 0x23f   :  { %1005 = vmatprep.mubr.bf16.mxu1 %v843_v32 }
 0x240   :  { %1006 = vmatmul.mubr.bf16.vlgmr.msra.gmra.mrb[8].mxu1 %v842_v33 }
 0x313   :  { %v1159_v34 = vpop.f32.mrb[8].mxu1 }
 0x314   :  { %v1160_v35 = vpop.f32.mrb[9].mxu1 }
 0x315   :  { %v1161_v17 = vadd.f32 %v1160_v35, %v1159_v34  ;;  %v1162_v20 = vpop.f32.mrb[10].mxu1 }
 0x316   :  { %v1163_v36 = vpop.f32.mrb[11].mxu1 }
 0x317   :  { %v1008_v37 = vadd.f32 %v1161_v17, %v876_v18 }
 0x319   :  { %1014 = vst.msk [vmem:[#allocation7] sm:$0x1] %vm1013_vm0, %v1008_v37 }
 0x31a   :  { %1394 = shalt.err (!%p1391_p6)
}
 0x31b   :  { %s1395_s19 = scalar_lea.hbm %s1586_s7, 16 }
 0x31c   :  { %p1396_p7 = scmp.ne.s32.totalorder %s1586_s7, %s1395_s19  ;;  %p1399_p8 = scmp.lt.u32.totalorder %s1395_s19, %s1586_s7 }
 0x31e   :  { %p1401_p9 = pnand %p1399_p8, %p1396_p7 }
 0x320   :  { %1404 = shalt.err (!%p1401_p9)
}
 0x321   :  { %1024 = dma.vmem_to_hbm [thread:$0]  %s1022_s15, 16, %s1586_s7, [#allocation4]  }
 0x322   :  { %1409 = dma.done.wait [#allocation4], 16  }
 0x323   :  { %1410 = vsyncadd [#allocation4], 4294967280 }
 0x324   :  { %1028 = vsyncpa [#allocation3], 1 }
 0x325   :  { %1029 = vsyncpa [#allocation6], 1 }
 0x326   :  { %1030 = vsyncpa [#allocation4], 1 }

</bundles_post_ra>
